<compile_context>
chip_gen: v5e
topology: v5e:2x2
jax: 0.10.0
libtpu: 0.0.40
codegen_flags: <defaults>
</compile_context>

<pallas_src>
import functools

import jax
import jax.numpy as jnp
from jax.experimental import pallas as pl

NUM_ATOM_TYPE = 120
NUM_CHIRALITY_TAG = 3
NUM_BOND_TYPE = 6
NUM_BOND_DIRECTION = 3


# ----------------------------- in-kernel helpers -----------------------------

def _leaky(x, slope):
    return jnp.where(x > 0, x, slope * x)


def _elu(x):
    # clamp before exp so large positives never produce inf on the dead branch
    return jnp.where(x > 0, x, jnp.exp(jnp.minimum(x, 0.0)) - 1.0)


def _seg_attn(alpha, inc):
    """Per-edge softmax weight grouped by destination.

    alpha: [E, 1] f32 edge scores; inc: [E, Nd] bf16 one-hot dst incidence.
    Returns [E, 1] f32 normalized attention weights.  The single masked [E, Nd]
    intermediate is reused for max, exp and normalization.
    """
    mask = inc.astype(jnp.float32) > 0.5
    masked = jnp.where(mask, alpha, -1e30)                     # [E, Nd]
    seg_max = jnp.max(masked, axis=0, keepdims=True)           # [1, Nd]
    p = jnp.where(mask, jnp.exp(masked - seg_max), 0.0)        # [E, Nd]
    denom = jnp.sum(p, axis=0, keepdims=True)                  # [1, Nd]
    pn = p * pl.reciprocal(jnp.maximum(denom, 1e-20), approx=True)
    return jnp.sum(pn, axis=-1, keepdims=True)                 # [E, 1]


def _gru_relu(h, x, wih_ref, whh_ref, bih_ref, bhh_ref):
    """nn.GRUCell(input=h, hidden=x) fused with .relu_().

    wih_ref/whh_ref: [3, D, D] (each slice is W_gate^T, lane-aligned),
    bih_ref/bhh_ref: [3, 1, D].
    """
    def gi(g):
        return jnp.dot(h, wih_ref[g], preferred_element_type=jnp.float32) + bih_ref[g]

    def gh(g):
        return jnp.dot(x, whh_ref[g], preferred_element_type=jnp.float32) + bhh_ref[g]

    r = jax.nn.sigmoid(gi(0) + gh(0))
    z = jax.nn.sigmoid(gi(1) + gh(1))
    n = jnp.tanh(gi(2) + r * gh(2))
    return jnp.maximum((1.0 - z) * n + z * x, 0.0)


# --------------------------------- kernels -----------------------------------

def layer0_kernel(xemb_ref, eemb_ref, ssrc_ref, sdst_ref, sdst_t_ref,
                  lin1_wt_ref, lin1_b_ref,
                  w1at_ref, w1bt_ref, attl_ref, attr_ref, w2t_ref, gbias_ref,
                  wih_ref, whh_ref, bih_ref, bhh_ref,
                  x_out_ref):
    """Fused: lin1 + leaky_relu + GATEConv(add self-loops done outside) + elu + GRU + relu."""
    # lin1 + leaky_relu_
    x = _leaky(jnp.dot(xemb_ref[...], lin1_wt_ref[...],
                       preferred_element_type=jnp.float32) + lin1_b_ref[...], 0.01)
    x_bf = x.astype(jnp.bfloat16)
    ssrc = ssrc_ref[...]                                        # [E, N] bf16
    sdst = sdst_ref[...]                                        # [E, N] bf16

    # GATEConv message
    x_j = jnp.dot(ssrc, x_bf, preferred_element_type=jnp.float32)        # [E, D]
    h = _leaky(jnp.dot(x_j, w1at_ref[...], preferred_element_type=jnp.float32)
               + jnp.dot(eemb_ref[...], w1bt_ref[...],
                         preferred_element_type=jnp.float32), 0.01)
    alpha_j = jnp.sum(h * attl_ref[...], axis=-1, keepdims=True)         # [E, 1]
    n_r = jnp.sum(x * attr_ref[...], axis=-1, keepdims=True)             # [N, 1]
    alpha_i = jnp.dot(sdst, n_r.astype(jnp.bfloat16),
                      preferred_element_type=jnp.float32)                # [E, 1]
    alpha = _leaky(alpha_j + alpha_i, 0.01)
    a = _seg_attn(alpha, sdst)                                           # [E, 1]
    msg = jnp.dot(h, w2t_ref[...], preferred_element_type=jnp.float32) * a
    h_conv = _elu(jnp.dot(sdst_t_ref[...], msg.astype(jnp.bfloat16),
                          preferred_element_type=jnp.float32) + gbias_ref[...])
    # GRU + relu
    x_out_ref[...] = _gru_relu(h_conv, x, wih_ref, whh_ref, bih_ref, bhh_ref)


def gat_gru_kernel(x_ref, ssrc_ref, sdst_ref, sdst_t_ref,
                   wt_ref, asrc_ref, adst_ref, gbias_ref,
                   wih_ref, whh_ref, bih_ref, bhh_ref,
                   x_out_ref):
    """Fused: PyG GATConv (1 head, no self loops) + elu + GRU + relu."""
    x = x_ref[...]
    hs = jnp.dot(x, wt_ref[...], preferred_element_type=jnp.float32)     # [N, D]
    a_s = jnp.sum(hs * asrc_ref[...], axis=-1, keepdims=True)            # [N, 1]
    a_d = jnp.sum(hs * adst_ref[...], axis=-1, keepdims=True)            # [N, 1]
    ssrc = ssrc_ref[...]
    sdst = sdst_ref[...]
    alpha = _leaky(jnp.dot(ssrc, a_s.astype(jnp.bfloat16),
                           preferred_element_type=jnp.float32)
                   + jnp.dot(sdst, a_d.astype(jnp.bfloat16),
                             preferred_element_type=jnp.float32), 0.2)
    a = _seg_attn(alpha, sdst)                                           # [E, 1]
    hs_bf = hs.astype(jnp.bfloat16)
    x_j = jnp.dot(ssrc, hs_bf, preferred_element_type=jnp.float32)       # [E, D]
    h_conv = _elu(jnp.dot(sdst_t_ref[...], (x_j * a).astype(jnp.bfloat16),
                          preferred_element_type=jnp.float32) + gbias_ref[...])
    x_out_ref[...] = _gru_relu(h_conv, x, wih_ref, whh_ref, bih_ref, bhh_ref)


def readout_kernel(x_ref, bmat_ref, bmat_t_ref,
                   wt_ref, asrc_ref, adst_ref, gbias_ref,
                   wih_ref, whh_ref, bih_ref, bhh_ref,
                   lin2_wt_ref, lin2_b_ref,
                   out_ref, pred_ref, *, num_timesteps):
    """Fused molecule readout: pool+relu, num_timesteps x (mol GATConv+elu+GRU+relu), lin2.

    The mol GATConv edge list is (node i -> graph batch[i]); since the source
    incidence is the identity, x_j == hs and no identity matmul is ever built.
    """
    x = x_ref[...]
    x_bf = x.astype(jnp.bfloat16)
    bmat = bmat_ref[...]                                        # [N, G] bf16
    bmat_t = bmat_t_ref[...]                                    # [G, N] bf16

    # global_add_pool(x, batch).relu_()
    out0 = jnp.maximum(jnp.dot(bmat_t, x_bf, preferred_element_type=jnp.float32), 0.0)

    # Source-side projections are invariant across timesteps (shared mol_conv).
    hs = jnp.dot(x, wt_ref[...], preferred_element_type=jnp.float32)     # [N, D]
    a_s = jnp.sum(hs * asrc_ref[...], axis=-1, keepdims=True)            # [N, 1]

    def step(_, out):
        hd = jnp.dot(out, wt_ref[...], preferred_element_type=jnp.float32)   # [G, D]
        a_d = jnp.sum(hd * adst_ref[...], axis=-1, keepdims=True)            # [G, 1]
        alpha = _leaky(a_s + jnp.dot(bmat, a_d.astype(jnp.bfloat16),
                                     preferred_element_type=jnp.float32), 0.2)
        a = _seg_attn(alpha, bmat)                                           # [N, 1]
        h_mol = _elu(jnp.dot(bmat_t, (hs * a).astype(jnp.bfloat16),
                             preferred_element_type=jnp.float32) + gbias_ref[...])
        return _gru_relu(h_mol, out, wih_ref, whh_ref, bih_ref, bhh_ref)

    out = jax.lax.fori_loop(0, num_timesteps, step, out0, unroll=True)
    out_ref[...] = out
    pred_ref[...] = (jnp.dot(out, lin2_wt_ref[...],
                             preferred_element_type=jnp.float32) + lin2_b_ref[...])


# ------------------------------ kernel wrappers -------------------------------

def _prep_gru(p):
    """Split + pre-transpose GRUCell weights into lane-aligned per-gate blocks."""
    d = p["w_hh"].shape[1]
    wih_t = jnp.transpose(p["w_ih"].reshape(3, d, d), (0, 2, 1))   # [3, D, D]
    whh_t = jnp.transpose(p["w_hh"].reshape(3, d, d), (0, 2, 1))
    return wih_t, whh_t, p["b_ih"].reshape(3, 1, d), p["b_hh"].reshape(3, 1, d)


def layer0(xemb, eemb, ssrc, sdst, sdst_t, lin1_w, lin1_b, gate_p, gru_p):
    n, d = xemb.shape
    wih_t, whh_t, bih, bhh = _prep_gru(gru_p)
    return pl.pallas_call(
        layer0_kernel,
        out_shape=jax.ShapeDtypeStruct((n, d), jnp.float32),
    )(xemb, eemb, ssrc, sdst, sdst_t,
      lin1_w.T, lin1_b.reshape(1, -1),
      gate_p["w1a"].T, gate_p["w1b"].T, gate_p["att_l"], gate_p["att_r"],
      gate_p["w2"].T, gate_p["bias"].reshape(1, -1),
      wih_t, whh_t, bih, bhh)


def gat_gru_layer(x, ssrc, sdst, sdst_t, gat_p, gru_p):
    n, d = x.shape
    wih_t, whh_t, bih, bhh = _prep_gru(gru_p)
    return pl.pallas_call(
        gat_gru_kernel,
        out_shape=jax.ShapeDtypeStruct((n, d), jnp.float32),
    )(x, ssrc, sdst, sdst_t,
      gat_p["w"].T, gat_p["att_src"].reshape(1, -1), gat_p["att_dst"].reshape(1, -1),
      gat_p["bias"].reshape(1, -1), wih_t, whh_t, bih, bhh)


def readout(x, bmat, bmat_t, gat_p, gru_p, lin2_w, lin2_b, num_timesteps):
    g = bmat.shape[1]
    d = x.shape[1]
    o = lin2_w.shape[0]
    wih_t, whh_t, bih, bhh = _prep_gru(gru_p)
    return pl.pallas_call(
        functools.partial(readout_kernel, num_timesteps=num_timesteps),
        out_shape=(jax.ShapeDtypeStruct((g, d), jnp.float32),
                   jax.ShapeDtypeStruct((g, o), jnp.float32)),
    )(x, bmat, bmat_t,
      gat_p["w"].T, gat_p["att_src"].reshape(1, -1), gat_p["att_dst"].reshape(1, -1),
      gat_p["bias"].reshape(1, -1), wih_t, whh_t, bih, bhh,
      lin2_w.T, lin2_b.reshape(1, -1))


# ------------------------------- parameter init -------------------------------

def init_params(key, emb_dim, num_layers, num_timesteps, output_dim):
    D = emb_dim
    keys = iter(jax.random.split(key, 128))

    def nrm(shape, scale=0.1):
        return (scale * jax.random.normal(next(keys), shape)).astype(jnp.float32)

    def gat_params():
        return dict(
            w=nrm((D, D)),
            att_src=nrm((D,)),
            att_dst=nrm((D,)),
            bias=jnp.zeros((D,), jnp.float32),
        )

    def gru_params():
        return dict(
            w_ih=nrm((3 * D, D)),
            w_hh=nrm((3 * D, D)),
            b_ih=nrm((3 * D,)),
            b_hh=nrm((3 * D,)),
        )

    params = dict(
        num_timesteps=num_timesteps,
        x_emb1=nrm((NUM_ATOM_TYPE, D)),
        x_emb2=nrm((NUM_CHIRALITY_TAG, D)),
        lin1_w=nrm((D, D)),
        lin1_b=nrm((D,)),
        gate=dict(
            edge_emb1=nrm((NUM_BOND_TYPE, D)),
            edge_emb2=nrm((NUM_BOND_DIRECTION, D)),
            att_l=nrm((1, D)),
            att_r=nrm((1, D)),
            w1a=nrm((D, D)),            # lin1.weight[:, :D]   (x_j half)
            w1b=nrm((D, D)),            # lin1.weight[:, D:]   (edge half)
            w2=nrm((D, D)),
            bias=jnp.zeros((D,), jnp.float32),
        ),
        gats=[gat_params() for _ in range(num_layers - 1)],
        grus=[gru_params() for _ in range(num_layers)],
        mol_gat=gat_params(),
        mol_gru=gru_params(),
        lin2_w=nrm((output_dim, D)),
        lin2_b=nrm((output_dim,)),
    )
    return params


# --------------------------------- forward ------------------------------------

def attentive_fp_forward(params, x_atom, edge_index, edge_attr, batch, num_graphs):
    N = x_atom.shape[0]

    # node embeddings (gather glue stays in plain JAX)
    xemb = params["x_emb1"][x_atom[:, 0]] + params["x_emb2"][x_atom[:, 1]]

    # --- layer 0: GATEConv (adds self loops with bond type 4) fused with GRU ---
    src, dst = edge_index[0], edge_index[1]
    loop = jnp.arange(N, dtype=src.dtype)
    src_sl = jnp.concatenate([src, loop])
    dst_sl = jnp.concatenate([dst, loop])
    loop_attr = jnp.stack(
        [jnp.full((N,), 4, edge_attr.dtype), jnp.zeros((N,), edge_attr.dtype)],
        axis=1)
    ea = jnp.concatenate([edge_attr, loop_attr], axis=0)
    eemb = (params["gate"]["edge_emb1"][ea[:, 0]]
            + params["gate"]["edge_emb2"][ea[:, 1]])

    # bf16 incidence matrices (exact 0/1) + trace-time transposed copies for
    # the scatter-adds, so kernels never transpose anything.
    ssrc_sl = jax.nn.one_hot(src_sl, N, dtype=jnp.bfloat16)     # [E+N, N]
    sdst_sl = jax.nn.one_hot(dst_sl, N, dtype=jnp.bfloat16)
    sdst_sl_t = sdst_sl.T

    x = layer0(xemb, eemb, ssrc_sl, sdst_sl, sdst_sl_t,
               params["lin1_w"], params["lin1_b"],
               params["gate"], params["grus"][0])

    # --- remaining atom layers: fused GATConv + GRU ---
    ssrc = jax.nn.one_hot(src, N, dtype=jnp.bfloat16)           # [E, N]
    sdst = jax.nn.one_hot(dst, N, dtype=jnp.bfloat16)
    sdst_t = sdst.T
    for gat_p, gru_p in zip(params["gats"], params["grus"][1:]):
        x = gat_gru_layer(x, ssrc, sdst, sdst_t, gat_p, gru_p)

    # --- fused molecule-level readout (pool + timesteps loop + lin2) ---
    bmat = jax.nn.one_hot(batch, num_graphs, dtype=jnp.bfloat16)   # [N, G]
    bmat_t = bmat.T
    out, pred = readout(x, bmat, bmat_t, params["mol_gat"], params["mol_gru"],
                        params["lin2_w"], params["lin2_b"],
                        params["num_timesteps"])
    return out, pred


# ----------------------------------- main --------------------------------------

if __name__ == "__main__":
    key = jax.random.PRNGKey(0)
    k_atom, k_chir, k_bt, k_bd, k_par = jax.random.split(key, 5)

    emb_dim = 32
    num_layers = 3
    num_timesteps = 2
    output_dim = 1            # task='regression'

    # two molecules of 5 atoms each, connected as directed rings
    N, G = 10, 2
    atom_type = jax.random.randint(k_atom, (N, 1), 0, NUM_ATOM_TYPE)
    chirality = jax.random.randint(k_chir, (N, 1), 0, NUM_CHIRALITY_TAG)
    x_atom = jnp.concatenate([atom_type, chirality], axis=1).astype(jnp.int32)

    edges = []
    for g in range(G):
        base = g * 5
        for i in range(5):
            a, b = base + i, base + (i + 1) % 5
            edges.append((a, b))
            edges.append((b, a))
    edge_index = jnp.array(edges, dtype=jnp.int32).T        # [2, E]
    E = edge_index.shape[1]
    bond_type = jax.random.randint(k_bt, (E, 1), 0, 4)      # 4 reserved for self loop
    bond_dir = jax.random.randint(k_bd, (E, 1), 0, NUM_BOND_DIRECTION)
    edge_attr = jnp.concatenate([bond_type, bond_dir], axis=1).astype(jnp.int32)
    batch = jnp.repeat(jnp.arange(G, dtype=jnp.int32), 5)   # [N]

    params = init_params(k_par, emb_dim, num_layers, num_timesteps, output_dim)

    out, pred = attentive_fp_forward(params, x_atom, edge_index, edge_attr,
                                     batch, G)
    jax.block_until_ready(out)
    jax.block_until_ready(pred)
    assert out.shape == (G, emb_dim) and pred.shape == (G, output_dim)
    print("KERNEL_OK")
</pallas_src>

<mosaic_0001>
module attributes {stable_mosaic.version = 11 : i64} {
  func.func @layer0_kernel(%arg0: memref<10x32xf32, #tpu.memory_space<vmem>>, %arg1: memref<30x32xf32, #tpu.memory_space<vmem>>, %arg2: memref<30x10xbf16, #tpu.memory_space<vmem>>, %arg3: memref<30x10xbf16, #tpu.memory_space<vmem>>, %arg4: memref<10x30xbf16, #tpu.memory_space<vmem>>, %arg5: memref<32x32xf32, #tpu.memory_space<vmem>>, %arg6: memref<1x32xf32, #tpu.memory_space<vmem>>, %arg7: memref<32x32xf32, #tpu.memory_space<vmem>>, %arg8: memref<32x32xf32, #tpu.memory_space<vmem>>, %arg9: memref<1x32xf32, #tpu.memory_space<vmem>>, %arg10: memref<1x32xf32, #tpu.memory_space<vmem>>, %arg11: memref<32x32xf32, #tpu.memory_space<vmem>>, %arg12: memref<1x32xf32, #tpu.memory_space<vmem>>, %arg13: memref<3x32x32xf32, #tpu.memory_space<vmem>>, %arg14: memref<3x32x32xf32, #tpu.memory_space<vmem>>, %arg15: memref<3x1x32xf32, #tpu.memory_space<vmem>>, %arg16: memref<3x1x32xf32, #tpu.memory_space<vmem>>, %arg17: memref<10x32xf32, #tpu.memory_space<vmem>>) attributes {dimension_semantics = [], scalar_prefetch = 0 : i64, scratch_operands = 0 : i64, tpu.core_type = #tpu.core_type<tc>} {
    %c0 = arith.constant 0 : index
    %c0_0 = arith.constant 0 : index
    %0 = vector.load %arg0[%c0, %c0_0] : memref<10x32xf32, #tpu.memory_space<vmem>>, vector<10x32xf32>
    %c0_1 = arith.constant 0 : index
    %c0_2 = arith.constant 0 : index
    %1 = vector.load %arg5[%c0_1, %c0_2] : memref<32x32xf32, #tpu.memory_space<vmem>>, vector<32x32xf32>
    %cst = arith.constant dense<0.000000e+00> : vector<10x32xf32>
    %2 = tpu.matmul %0, %1, %cst {dimension_numbers = #tpu.dot_dimension_numbers<[1], [0], [0], [1], [0, 0, 1, 1], [], []>} : vector<10x32xf32>, vector<32x32xf32>, vector<10x32xf32> -> vector<10x32xf32>
    %c0_3 = arith.constant 0 : index
    %c0_4 = arith.constant 0 : index
    %3 = vector.load %arg6[%c0_3, %c0_4] : memref<1x32xf32, #tpu.memory_space<vmem>>, vector<1x32xf32>
    %4 = vector.broadcast %3 : vector<1x32xf32> to vector<10x32xf32>
    %5 = arith.addf %2, %4 : vector<10x32xf32>
    %cst_5 = arith.constant 0.000000e+00 : f32
    %6 = vector.broadcast %cst_5 : f32 to vector<10x32xf32>
    %7 = arith.cmpf ogt, %5, %6 : vector<10x32xf32>
    %cst_6 = arith.constant 0.00999999977 : f32
    %8 = vector.broadcast %cst_6 : f32 to vector<10x32xf32>
    %9 = arith.mulf %8, %5 : vector<10x32xf32>
    %10 = arith.select %7, %5, %9 : vector<10x32xi1>, vector<10x32xf32>
    %11 = arith.truncf %10 : vector<10x32xf32> to vector<10x32xbf16>
    %c0_7 = arith.constant 0 : index
    %c0_8 = arith.constant 0 : index
    %12 = vector.load %arg2[%c0_7, %c0_8] : memref<30x10xbf16, #tpu.memory_space<vmem>>, vector<30x10xbf16>
    %c0_9 = arith.constant 0 : index
    %c0_10 = arith.constant 0 : index
    %13 = vector.load %arg3[%c0_9, %c0_10] : memref<30x10xbf16, #tpu.memory_space<vmem>>, vector<30x10xbf16>
    %cst_11 = arith.constant dense<0.000000e+00> : vector<30x32xf32>
    %14 = tpu.matmul %12, %11, %cst_11 {dimension_numbers = #tpu.dot_dimension_numbers<[1], [0], [0], [1], [0, 0, 1, 1], [], []>} : vector<30x10xbf16>, vector<10x32xbf16>, vector<30x32xf32> -> vector<30x32xf32>
    %c0_12 = arith.constant 0 : index
    %c0_13 = arith.constant 0 : index
    %15 = vector.load %arg7[%c0_12, %c0_13] : memref<32x32xf32, #tpu.memory_space<vmem>>, vector<32x32xf32>
    %cst_14 = arith.constant dense<0.000000e+00> : vector<30x32xf32>
    %16 = tpu.matmul %14, %15, %cst_14 {dimension_numbers = #tpu.dot_dimension_numbers<[1], [0], [0], [1], [0, 0, 1, 1], [], []>} : vector<30x32xf32>, vector<32x32xf32>, vector<30x32xf32> -> vector<30x32xf32>
    %c0_15 = arith.constant 0 : index
    %c0_16 = arith.constant 0 : index
    %17 = vector.load %arg1[%c0_15, %c0_16] : memref<30x32xf32, #tpu.memory_space<vmem>>, vector<30x32xf32>
    %c0_17 = arith.constant 0 : index
    %c0_18 = arith.constant 0 : index
    %18 = vector.load %arg8[%c0_17, %c0_18] : memref<32x32xf32, #tpu.memory_space<vmem>>, vector<32x32xf32>
    %cst_19 = arith.constant dense<0.000000e+00> : vector<30x32xf32>
    %19 = tpu.matmul %17, %18, %cst_19 {dimension_numbers = #tpu.dot_dimension_numbers<[1], [0], [0], [1], [0, 0, 1, 1], [], []>} : vector<30x32xf32>, vector<32x32xf32>, vector<30x32xf32> -> vector<30x32xf32>
    %20 = arith.addf %16, %19 : vector<30x32xf32>
    %cst_20 = arith.constant 0.000000e+00 : f32
    %21 = vector.broadcast %cst_20 : f32 to vector<30x32xf32>
    %22 = arith.cmpf ogt, %20, %21 : vector<30x32xf32>
    %cst_21 = arith.constant 0.00999999977 : f32
    %23 = vector.broadcast %cst_21 : f32 to vector<30x32xf32>
    %24 = arith.mulf %23, %20 : vector<30x32xf32>
    %25 = arith.select %22, %20, %24 : vector<30x32xi1>, vector<30x32xf32>
    %c0_22 = arith.constant 0 : index
    %c0_23 = arith.constant 0 : index
    %26 = vector.load %arg9[%c0_22, %c0_23] : memref<1x32xf32, #tpu.memory_space<vmem>>, vector<1x32xf32>
    %27 = vector.broadcast %26 : vector<1x32xf32> to vector<30x32xf32>
    %28 = arith.mulf %25, %27 : vector<30x32xf32>
    %cst_24 = arith.constant dense<0.000000e+00> : vector<30xf32>
    %29 = vector.multi_reduction <add>, %28, %cst_24 [1] : vector<30x32xf32> to vector<30xf32>
    %30 = vector.shape_cast %29 : vector<30xf32> to vector<30x1xf32>
    %c0_25 = arith.constant 0 : index
    %c0_26 = arith.constant 0 : index
    %31 = vector.load %arg10[%c0_25, %c0_26] : memref<1x32xf32, #tpu.memory_space<vmem>>, vector<1x32xf32>
    %32 = vector.broadcast %31 : vector<1x32xf32> to vector<10x32xf32>
    %33 = arith.mulf %10, %32 : vector<10x32xf32>
    %cst_27 = arith.constant dense<0.000000e+00> : vector<10xf32>
    %34 = vector.multi_reduction <add>, %33, %cst_27 [1] : vector<10x32xf32> to vector<10xf32>
    %35 = vector.shape_cast %34 : vector<10xf32> to vector<10x1xf32>
    %36 = arith.truncf %35 : vector<10x1xf32> to vector<10x1xbf16>
    %cst_28 = arith.constant dense<0.000000e+00> : vector<30x1xf32>
    %37 = tpu.matmul %13, %36, %cst_28 {dimension_numbers = #tpu.dot_dimension_numbers<[1], [0], [0], [1], [0, 0, 1, 1], [], []>} : vector<30x10xbf16>, vector<10x1xbf16>, vector<30x1xf32> -> vector<30x1xf32>
    %38 = arith.addf %30, %37 : vector<30x1xf32>
    %cst_29 = arith.constant 0.000000e+00 : f32
    %39 = vector.broadcast %cst_29 : f32 to vector<30x1xf32>
    %40 = arith.cmpf ogt, %38, %39 : vector<30x1xf32>
    %cst_30 = arith.constant 0.00999999977 : f32
    %41 = vector.broadcast %cst_30 : f32 to vector<30x1xf32>
    %42 = arith.mulf %41, %38 : vector<30x1xf32>
    %43 = arith.select %40, %38, %42 : vector<30x1xi1>, vector<30x1xf32>
    %44 = arith.extf %13 : vector<30x10xbf16> to vector<30x10xf32>
    %cst_31 = arith.constant 5.000000e-01 : f32
    %45 = vector.broadcast %cst_31 : f32 to vector<30x10xf32>
    %46 = arith.cmpf ogt, %44, %45 : vector<30x10xf32>
    %cst_32 = arith.constant -1.000000e+30 : f32
    %47 = vector.shape_cast %43 : vector<30x1xf32> to vector<30x1xf32>
    %48 = vector.broadcast %47 : vector<30x1xf32> to vector<30x10xf32>
    %49 = vector.broadcast %cst_32 : f32 to vector<30x10xf32>
    %50 = arith.select %46, %48, %49 : vector<30x10xi1>, vector<30x10xf32>
    %cst_33 = arith.constant dense<0xFF800000> : vector<10xf32>
    %51 = vector.multi_reduction <maximumf>, %50, %cst_33 [0] : vector<30x10xf32> to vector<10xf32>
    %52 = vector.shape_cast %51 : vector<10xf32> to vector<1x10xf32>
    %53 = vector.broadcast %52 : vector<1x10xf32> to vector<30x10xf32>
    %54 = arith.subf %50, %53 : vector<30x10xf32>
    %55 = math.exp %54 : vector<30x10xf32>
    %cst_34 = arith.constant 0.000000e+00 : f32
    %56 = vector.broadcast %cst_34 : f32 to vector<30x10xf32>
    %57 = arith.select %46, %55, %56 : vector<30x10xi1>, vector<30x10xf32>
    %cst_35 = arith.constant dense<0.000000e+00> : vector<10xf32>
    %58 = vector.multi_reduction <add>, %57, %cst_35 [0] : vector<30x10xf32> to vector<10xf32>
    %59 = vector.shape_cast %58 : vector<10xf32> to vector<1x10xf32>
    %cst_36 = arith.constant 9.99999968E-21 : f32
    %60 = vector.broadcast %cst_36 : f32 to vector<1x10xf32>
    %61 = arith.maximumf %59, %60 : vector<1x10xf32>
    %62 = tpu.reciprocal %61 {approx = true} : vector<1x10xf32> -> vector<1x10xf32>
    %63 = vector.broadcast %62 : vector<1x10xf32> to vector<30x10xf32>
    %64 = arith.mulf %57, %63 : vector<30x10xf32>
    %cst_37 = arith.constant dense<0.000000e+00> : vector<30xf32>
    %65 = vector.multi_reduction <add>, %64, %cst_37 [1] : vector<30x10xf32> to vector<30xf32>
    %66 = vector.shape_cast %65 : vector<30xf32> to vector<30x1xf32>
    %c0_38 = arith.constant 0 : index
    %c0_39 = arith.constant 0 : index
    %67 = vector.load %arg11[%c0_38, %c0_39] : memref<32x32xf32, #tpu.memory_space<vmem>>, vector<32x32xf32>
    %cst_40 = arith.constant dense<0.000000e+00> : vector<30x32xf32>
    %68 = tpu.matmul %25, %67, %cst_40 {dimension_numbers = #tpu.dot_dimension_numbers<[1], [0], [0], [1], [0, 0, 1, 1], [], []>} : vector<30x32xf32>, vector<32x32xf32>, vector<30x32xf32> -> vector<30x32xf32>
    %69 = vector.broadcast %66 : vector<30x1xf32> to vector<30x32xf32>
    %70 = arith.mulf %68, %69 : vector<30x32xf32>
    %c0_41 = arith.constant 0 : index
    %c0_42 = arith.constant 0 : index
    %71 = vector.load %arg4[%c0_41, %c0_42] : memref<10x30xbf16, #tpu.memory_space<vmem>>, vector<10x30xbf16>
    %72 = arith.truncf %70 : vector<30x32xf32> to vector<30x32xbf16>
    %cst_43 = arith.constant dense<0.000000e+00> : vector<10x32xf32>
    %73 = tpu.matmul %71, %72, %cst_43 {dimension_numbers = #tpu.dot_dimension_numbers<[1], [0], [0], [1], [0, 0, 1, 1], [], []>} : vector<10x30xbf16>, vector<30x32xbf16>, vector<10x32xf32> -> vector<10x32xf32>
    %c0_44 = arith.constant 0 : index
    %c0_45 = arith.constant 0 : index
    %74 = vector.load %arg12[%c0_44, %c0_45] : memref<1x32xf32, #tpu.memory_space<vmem>>, vector<1x32xf32>
    %75 = vector.broadcast %74 : vector<1x32xf32> to vector<10x32xf32>
    %76 = arith.addf %73, %75 : vector<10x32xf32>
    %cst_46 = arith.constant 0.000000e+00 : f32
    %77 = vector.broadcast %cst_46 : f32 to vector<10x32xf32>
    %78 = arith.cmpf ogt, %76, %77 : vector<10x32xf32>
    %cst_47 = arith.constant 0.000000e+00 : f32
    %79 = vector.broadcast %cst_47 : f32 to vector<10x32xf32>
    %80 = arith.minimumf %76, %79 : vector<10x32xf32>
    %81 = math.exp %80 : vector<10x32xf32>
    %cst_48 = arith.constant 1.000000e+00 : f32
    %82 = vector.broadcast %cst_48 : f32 to vector<10x32xf32>
    %83 = arith.subf %81, %82 : vector<10x32xf32>
    %84 = arith.select %78, %76, %83 : vector<10x32xi1>, vector<10x32xf32>
    %c0_49 = arith.constant 0 : index
    %c0_50 = arith.constant 0 : index
    %c0_51 = arith.constant 0 : index
    %85 = vector.load %arg13[%c0_49, %c0_50, %c0_51] : memref<3x32x32xf32, #tpu.memory_space<vmem>>, vector<1x32x32xf32>
    %86 = vector.shape_cast %85 : vector<1x32x32xf32> to vector<32x32xf32>
    %cst_52 = arith.constant dense<0.000000e+00> : vector<10x32xf32>
    %87 = tpu.matmul %84, %86, %cst_52 {dimension_numbers = #tpu.dot_dimension_numbers<[1], [0], [0], [1], [0, 0, 1, 1], [], []>} : vector<10x32xf32>, vector<32x32xf32>, vector<10x32xf32> -> vector<10x32xf32>
    %c0_53 = arith.constant 0 : index
    %c0_54 = arith.constant 0 : index
    %c0_55 = arith.constant 0 : index
    %88 = vector.load %arg15[%c0_53, %c0_54, %c0_55] : memref<3x1x32xf32, #tpu.memory_space<vmem>>, vector<1x1x32xf32>
    %89 = vector.shape_cast %88 : vector<1x1x32xf32> to vector<1x32xf32>
    %90 = vector.broadcast %89 : vector<1x32xf32> to vector<10x32xf32>
    %91 = arith.addf %87, %90 : vector<10x32xf32>
    %c0_56 = arith.constant 0 : index
    %c0_57 = arith.constant 0 : index
    %c0_58 = arith.constant 0 : index
    %92 = vector.load %arg14[%c0_56, %c0_57, %c0_58] : memref<3x32x32xf32, #tpu.memory_space<vmem>>, vector<1x32x32xf32>
    %93 = vector.shape_cast %92 : vector<1x32x32xf32> to vector<32x32xf32>
    %cst_59 = arith.constant dense<0.000000e+00> : vector<10x32xf32>
    %94 = tpu.matmul %10, %93, %cst_59 {dimension_numbers = #tpu.dot_dimension_numbers<[1], [0], [0], [1], [0, 0, 1, 1], [], []>} : vector<10x32xf32>, vector<32x32xf32>, vector<10x32xf32> -> vector<10x32xf32>
    %c0_60 = arith.constant 0 : index
    %c0_61 = arith.constant 0 : index
    %c0_62 = arith.constant 0 : index
    %95 = vector.load %arg16[%c0_60, %c0_61, %c0_62] : memref<3x1x32xf32, #tpu.memory_space<vmem>>, vector<1x1x32xf32>
    %96 = vector.shape_cast %95 : vector<1x1x32xf32> to vector<1x32xf32>
    %97 = vector.broadcast %96 : vector<1x32xf32> to vector<10x32xf32>
    %98 = arith.addf %94, %97 : vector<10x32xf32>
    %99 = arith.addf %91, %98 : vector<10x32xf32>
    %100 = arith.negf %99 : vector<10x32xf32>
    %101 = math.exp %100 : vector<10x32xf32>
    %cst_63 = arith.constant 1.000000e+00 : f32
    %102 = vector.broadcast %cst_63 : f32 to vector<10x32xf32>
    %103 = arith.addf %102, %101 : vector<10x32xf32>
    %104 = arith.divf %102, %103 : vector<10x32xf32>
    %c1 = arith.constant 1 : index
    %c0_64 = arith.constant 0 : index
    %c0_65 = arith.constant 0 : index
    %105 = vector.load %arg13[%c1, %c0_64, %c0_65] : memref<3x32x32xf32, #tpu.memory_space<vmem>>, vector<1x32x32xf32>
    %106 = vector.shape_cast %105 : vector<1x32x32xf32> to vector<32x32xf32>
    %cst_66 = arith.constant dense<0.000000e+00> : vector<10x32xf32>
    %107 = tpu.matmul %84, %106, %cst_66 {dimension_numbers = #tpu.dot_dimension_numbers<[1], [0], [0], [1], [0, 0, 1, 1], [], []>} : vector<10x32xf32>, vector<32x32xf32>, vector<10x32xf32> -> vector<10x32xf32>
    %c1_67 = arith.constant 1 : index
    %c0_68 = arith.constant 0 : index
    %c0_69 = arith.constant 0 : index
    %108 = vector.load %arg15[%c1_67, %c0_68, %c0_69] : memref<3x1x32xf32, #tpu.memory_space<vmem>>, vector<1x1x32xf32>
    %109 = vector.shape_cast %108 : vector<1x1x32xf32> to vector<1x32xf32>
    %110 = vector.broadcast %109 : vector<1x32xf32> to vector<10x32xf32>
    %111 = arith.addf %107, %110 : vector<10x32xf32>
    %c1_70 = arith.constant 1 : index
    %c0_71 = arith.constant 0 : index
    %c0_72 = arith.constant 0 : index
    %112 = vector.load %arg14[%c1_70, %c0_71, %c0_72] : memref<3x32x32xf32, #tpu.memory_space<vmem>>, vector<1x32x32xf32>
    %113 = vector.shape_cast %112 : vector<1x32x32xf32> to vector<32x32xf32>
    %cst_73 = arith.constant dense<0.000000e+00> : vector<10x32xf32>
    %114 = tpu.matmul %10, %113, %cst_73 {dimension_numbers = #tpu.dot_dimension_numbers<[1], [0], [0], [1], [0, 0, 1, 1], [], []>} : vector<10x32xf32>, vector<32x32xf32>, vector<10x32xf32> -> vector<10x32xf32>
    %c1_74 = arith.constant 1 : index
    %c0_75 = arith.constant 0 : index
    %c0_76 = arith.constant 0 : index
    %115 = vector.load %arg16[%c1_74, %c0_75, %c0_76] : memref<3x1x32xf32, #tpu.memory_space<vmem>>, vector<1x1x32xf32>
    %116 = vector.shape_cast %115 : vector<1x1x32xf32> to vector<1x32xf32>
    %117 = vector.broadcast %116 : vector<1x32xf32> to vector<10x32xf32>
    %118 = arith.addf %114, %117 : vector<10x32xf32>
    %119 = arith.addf %111, %118 : vector<10x32xf32>
    %120 = arith.negf %119 : vector<10x32xf32>
    %121 = math.exp %120 : vector<10x32xf32>
    %cst_77 = arith.constant 1.000000e+00 : f32
    %122 = vector.broadcast %cst_77 : f32 to vector<10x32xf32>
    %123 = arith.addf %122, %121 : vector<10x32xf32>
    %124 = arith.divf %122, %123 : vector<10x32xf32>
    %c2 = arith.constant 2 : index
    %c0_78 = arith.constant 0 : index
    %c0_79 = arith.constant 0 : index
    %125 = vector.load %arg13[%c2, %c0_78, %c0_79] : memref<3x32x32xf32, #tpu.memory_space<vmem>>, vector<1x32x32xf32>
    %126 = vector.shape_cast %125 : vector<1x32x32xf32> to vector<32x32xf32>
    %cst_80 = arith.constant dense<0.000000e+00> : vector<10x32xf32>
    %127 = tpu.matmul %84, %126, %cst_80 {dimension_numbers = #tpu.dot_dimension_numbers<[1], [0], [0], [1], [0, 0, 1, 1], [], []>} : vector<10x32xf32>, vector<32x32xf32>, vector<10x32xf32> -> vector<10x32xf32>
    %c2_81 = arith.constant 2 : index
    %c0_82 = arith.constant 0 : index
    %c0_83 = arith.constant 0 : index
    %128 = vector.load %arg15[%c2_81, %c0_82, %c0_83] : memref<3x1x32xf32, #tpu.memory_space<vmem>>, vector<1x1x32xf32>
    %129 = vector.shape_cast %128 : vector<1x1x32xf32> to vector<1x32xf32>
    %130 = vector.broadcast %129 : vector<1x32xf32> to vector<10x32xf32>
    %131 = arith.addf %127, %130 : vector<10x32xf32>
    %c2_84 = arith.constant 2 : index
    %c0_85 = arith.constant 0 : index
    %c0_86 = arith.constant 0 : index
    %132 = vector.load %arg14[%c2_84, %c0_85, %c0_86] : memref<3x32x32xf32, #tpu.memory_space<vmem>>, vector<1x32x32xf32>
    %133 = vector.shape_cast %132 : vector<1x32x32xf32> to vector<32x32xf32>
    %cst_87 = arith.constant dense<0.000000e+00> : vector<10x32xf32>
    %134 = tpu.matmul %10, %133, %cst_87 {dimension_numbers = #tpu.dot_dimension_numbers<[1], [0], [0], [1], [0, 0, 1, 1], [], []>} : vector<10x32xf32>, vector<32x32xf32>, vector<10x32xf32> -> vector<10x32xf32>
    %c2_88 = arith.constant 2 : index
    %c0_89 = arith.constant 0 : index
    %c0_90 = arith.constant 0 : index
    %135 = vector.load %arg16[%c2_88, %c0_89, %c0_90] : memref<3x1x32xf32, #tpu.memory_space<vmem>>, vector<1x1x32xf32>
    %136 = vector.shape_cast %135 : vector<1x1x32xf32> to vector<1x32xf32>
    %137 = vector.broadcast %136 : vector<1x32xf32> to vector<10x32xf32>
    %138 = arith.addf %134, %137 : vector<10x32xf32>
    %139 = arith.mulf %104, %138 : vector<10x32xf32>
    %140 = arith.addf %131, %139 : vector<10x32xf32>
    %141 = math.tanh %140 : vector<10x32xf32>
    %cst_91 = arith.constant 1.000000e+00 : f32
    %142 = vector.broadcast %cst_91 : f32 to vector<10x32xf32>
    %143 = arith.subf %142, %124 : vector<10x32xf32>
    %144 = arith.mulf %143, %141 : vector<10x32xf32>
    %145 = arith.mulf %124, %10 : vector<10x32xf32>
    %146 = arith.addf %144, %145 : vector<10x32xf32>
    %cst_92 = arith.constant 0.000000e+00 : f32
    %147 = vector.broadcast %cst_92 : f32 to vector<10x32xf32>
    %148 = arith.maximumf %146, %147 : vector<10x32xf32>
    %c0_93 = arith.constant 0 : index
    %c0_94 = arith.constant 0 : index
    %149 = vector.load %arg17[%c0_93, %c0_94] : memref<10x32xf32, #tpu.memory_space<vmem>>, vector<10x32xf32>
    tpu.vector_store %arg17[%c0_93, %c0_94], %148 {strides = array<i32>} : memref<10x32xf32, #tpu.memory_space<vmem>>, vector<10x32xf32>,
    return
  }
}

</mosaic_0001>

<bundles_post_ra>
// kernel: tpu_custom_call.1
= control target key start
LH: loop header
LB: loop body
LE: loop exit
PB: predicated region body
PF: predicated region fallthrough
CT: control target
= control target key end

     0   :  { %s1672_s0 = inlined_call_operand.hbm [shape: f32[10,32], index: 0, kind: input, shape index: {}]   ;;  %s1673_s1 = inlined_call_operand.vmem [shape: f32[30,32], index: 1, kind: input, shape index: {}]   ;;  %s1674_s2 = inlined_call_operand.vmem [shape: bf16[30,10], index: 2, kind: input, shape index: {}]   ;;  %s1675_s3 = inlined_call_operand.vmem [shape: bf16[30,10], index: 3, kind: input, shape index: {}]   ;;  %s1676_s4 = inlined_call_operand.vmem [shape: bf16[10,30], index: 4, kind: input, shape index: {}]   ;;  %s1677_s5 = inlined_call_operand.hbm [shape: f32[32,32], index: 5, kind: input, shape index: {}]   ;;  %s1678_s6 = inlined_call_operand.hbm [shape: f32[1,32], index: 6, kind: input, shape index: {}]   ;;  %s1679_s7 = inlined_call_operand.hbm [shape: f32[32,32], index: 7, kind: input, shape index: {}]   ;;  %s1680_s8 = inlined_call_operand.hbm [shape: f32[32,32], index: 8, kind: input, shape index: {}]   ;;  %s1681_s9 = inlined_call_operand.vmem [shape: f32[1,32], index: 9, kind: input, shape index: {}]   ;;  %s1682_s10 = inlined_call_operand.vmem [shape: f32[1,32], index: 10, kind: input, shape index: {}]   ;;  %s1683_s11 = inlined_call_operand.hbm [shape: f32[32,32], index: 11, kind: input, shape index: {}]   ;;  %s1684_s12 = inlined_call_operand.vmem [shape: f32[1,32], index: 12, kind: input, shape index: {}]   ;;  %s1685_s13 = inlined_call_operand.hbm [shape: f32[3,32,32], index: 13, kind: input, shape index: {}]   ;;  %s1686_s14 = inlined_call_operand.hbm [shape: f32[3,32,32], index: 14, kind: input, shape index: {}]   ;;  %s1687_s15 = inlined_call_operand.vmem [shape: f32[3,1,32], index: 15, kind: input, shape index: {}]   ;;  %s1688_s16 = inlined_call_operand.vmem [shape: f32[3,1,32], index: 16, kind: input, shape index: {}]   ;;  %s1689_s17 = inlined_call_operand.hbm [shape: f32[10,32], index: 17, kind: output, shape index: {}]  }
   0x1   :  { %1691 = sst [smem:[#allocation23_spill]] %s1672_s0 }
   0x2   :  { %1692 = sst [smem:[#allocation24_spill]] %s1673_s1 }
   0x3   :  { %22 = vsyncpa [#allocation3], 0 }
   0x4   :  { %23 = vsyncpa [#allocation6], 0 }
   0x5   :  { %24 = vsyncpa [#allocation9], 0 }
   0x6   :  { %25 = vsyncpa [#allocation12], 0 }
   0x7   :  { %26 = vsyncpa [#allocation15], 0 }
   0x8   :  { %27 = vsyncpa [#allocation4], 0  ;;  %s53_s26 = sshll.u32 %s1677_s5, 4  ;;  %s1348_s27 = smov [#allocation5]   ;;  %s54_s26 = int_to_ptr.hbm [resolvable:$true] %s53_s26 }
   0x9   :  { %s55_s28 = sshll.u32 %s1348_s27, 4  ;;  %s77_s30 = sshll.u32 %s1679_s7, 4  ;;  %s56_s28 = int_to_ptr.vmem [resolvable:$true] %s55_s28  ;;  %s78_s30 = int_to_ptr.hbm [resolvable:$true] %s77_s30 }
   0xa   :  { %s1349_s18 = smov 128   ;;  %s1350_s19 = smov 8  }
   0xb   :  { %61 = dma.hbm_to_vmem [thread:$0]  %s54_s26, 512, %s56_s28, [#allocation6], %s1349_s18, %s1349_s18, %s1350_s19  }
   0xc   :  { %s1351_s1 = smov [#allocation8]   ;;  %s107_s5 = sshll.u32 %s1683_s11, 4  ;;  %s108_s5 = int_to_ptr.hbm [resolvable:$true] %s107_s5 }
   0xd   :  { %s79_s20 = sshll.u32 %s1351_s1, 4  ;;  %s1693_s24 = sld [smem:[#allocation23_spill]]  ;;  %s80_s20 = int_to_ptr.vmem [resolvable:$true] %s79_s20 }
   0xe   :  { %85 = dma.hbm_to_vmem [thread:$0]  %s78_s30, 512, %s80_s20, [#allocation9], %s1349_s18, %s1349_s18, %s1350_s19  }
   0xf   :  { %s1352_s27 = smov [#allocation11]   ;;  %s1353_s26 = smov [#allocation2]  }
  0x10   :  { %s109_s29 = sshll.u32 %s1352_s27, 4  ;;  %s34_s11 = sshll.u32 %s1353_s26, 4  ;;  %s110_s29 = int_to_ptr.vmem [resolvable:$true] %s109_s29  ;;  %s35_s11 = int_to_ptr.vmem [resolvable:$true] %s34_s11 }
  0x11   :  { %115 = dma.hbm_to_vmem [thread:$0]  %s108_s5, 512, %s110_s29, [#allocation12], %s1349_s18, %s1349_s18, %s1350_s19  }
  0x12   :  { %s67_s1 = sshll.u32 %s1678_s6, 4  ;;  %s90_s21 = sshll.u32 %s1680_s8, 4  ;;  %s68_s1 = int_to_ptr.hbm [resolvable:$true] %s67_s1  ;;  %s91_s21 = int_to_ptr.hbm [resolvable:$true] %s90_s21 }
  0x13   :  { %s32_s25 = sshll.u32 %s1693_s24, 4  ;;  %s1354_s22 = smov [#allocation7]   ;;  %s33_s25 = int_to_ptr.hbm [resolvable:$true] %s32_s25 }
  0x14   :  { %40 = dma.hbm_to_vmem [thread:$0]  %s33_s25, 256, %s35_s11, [#allocation3], %s1349_s18, %s1349_s18, %s1350_s19  }
  0x15   :  { %s69_s7 = sshll.u32 %s1354_s22, 4  ;;  %s1355_s5 = smov [#allocation10]   ;;  %s70_s7 = int_to_ptr.vmem [resolvable:$true] %s69_s7 }
  0x16   :  { %72 = dma.hbm_to_vmem [thread:$0]  %s68_s1, 16, %s70_s7, [#allocation6]  }
  0x17   :  { %s92_s23 = sshll.u32 %s1355_s5, 4  ;;  %s122_s6 = sshll.u32 %s1685_s13, 4  ;;  %s93_s23 = int_to_ptr.vmem [resolvable:$true] %s92_s23  ;;  %s123_s6 = int_to_ptr.hbm [resolvable:$true] %s122_s6 }
  0x18   :  { %98 = dma.hbm_to_vmem [thread:$0]  %s91_s21, 512, %s93_s23, [#allocation9], %s1349_s18, %s1349_s18, %s1350_s19  }
  0x19   :  { %s135_s8 = sshll.u32 %s1686_s14, 4  ;;  %s1356_s26 = smov [#allocation13]   ;;  %s136_s8 = int_to_ptr.hbm [resolvable:$true] %s135_s8 }
  0x1a   :  { %s124_s11 = sshll.u32 %s1356_s26, 4  ;;  %s1357_s28 = smov [#allocation14]   ;;  %s125_s11 = int_to_ptr.vmem [resolvable:$true] %s124_s11 }
  0x1b   :  { %130 = dma.hbm_to_vmem [thread:$0]  %s123_s6, 1536, %s125_s11, [#allocation12], %s1349_s18, %s1349_s18, %s1350_s19  }
  0x1c   :  { %s137_s13 = sshll.u32 %s1357_s28, 4  ;;  %s138_s13 = int_to_ptr.vmem [resolvable:$true] %s137_s13 }
  0x1d   :  { %143 = dma.hbm_to_vmem [thread:$0]  %s136_s8, 1536, %s138_s13, [#allocation15], %s1349_s18, %s1349_s18, %s1350_s19  }
  0x1e   :  { %1336 = dma.done.wait [#allocation3], 256  }
  0x1f   :  { %1337 = vsyncadd [#allocation3], 4294967040 }
  0x20   :  { %1338 = dma.done.wait [#allocation6], 528  }
  0x21   :  { %1339 = vsyncadd [#allocation6], 4294966768 }
  0x22   :  { %1340 = dma.done.wait [#allocation9], 1024  }
  0x23   :  { %1341 = vsyncadd [#allocation9], 4294966272 }
  0x24   :  { %1342 = dma.done.wait [#allocation12], 2048  }
  0x25   :  { %1343 = vsyncadd [#allocation12], 4294965248 }
  0x26   :  { %1344 = dma.done.wait [#allocation15], 1536  }
  0x27   :  { %1345 = vsyncadd [#allocation15], 4294965760  ;;  %v186_v0 = vld [vmem:[#allocation5 + $0x18] sm:$0xff]  ;;  %v185_v1 = vld [vmem:[#allocation5 + $0x10] sm:$0xff]  ;;  %vm191_vm0 = vcmask 261120   ;;  %vm253_vm3 = vcmask 1044480  }
  0x28   :  { %210 = vmatpush.msra.mxu0 %v186_v0  ;;  %1053 = vmatpush.msra.mxu2 %v186_v0  ;;  %v184_v2 = vld [vmem:[#allocation5 + $0x8] sm:$0xff]  ;;  %v183_v3 = vld [vmem:[#allocation5] sm:$0xff]  ;;  %v181_v4 = vld [vmem:[#allocation2] sm:$0xff]  ;;  %vm412_vm4 = vcmask 254976   ;;  %vm246_vm5 = vcmask 80896   ;;  %s1694_s5 = sld [smem:[#allocation24_spill]] }
  0x29   :  { %v182_v5 = vld [vmem:[#allocation2 + $0x8] sm:$0x3]  ;;  %v1076_v6 = vld [vmem:[#allocation7] ss:$0 sm:$0xff]  ;;  %v1077_v9 = vld [vmem:[%s1682_s10] ss:$0 sm:$0xff] }
  0x2a   :  { %211 = vmatpush.msra.mxu0 %v185_v1  ;;  %1054 = vmatpush.msra.mxu2 %v185_v1  ;;  %v1048_v21 = vld [vmem:[%s1674_s2] sm:$0xff]  ;;  %v995_v23 = vld [vmem:[%s1674_s2 + $0x8] sm:$0xf]  ;;  %v1049_v24 = vld [vmem:[%s1674_s2 + $0x8] sm:$0x70]  ;;  %vm399_vm10 = vcmask 259072  }
  0x2b   :  { %v996_v25 = vor.u32 %v1049_v24, %v995_v23  ;;  %v287_v26 = vld [vmem:[#allocation10 + $0x18] sm:$0xff]  ;;  %v286_v28 = vld [vmem:[#allocation10 + $0x10] sm:$0xff]  ;;  %v285_v30 = vld [vmem:[#allocation10 + $0x8] sm:$0xff] }
  0x2c   :  { %212 = vmatpush.msra.mxu0 %v184_v2  ;;  %1055 = vmatpush.msra.mxu2 %v184_v2  ;;  %v279_v27 = vld [vmem:[#allocation8 + $0x18] sm:$0xff]  ;;  %v278_v29 = vld [vmem:[#allocation8 + $0x10] sm:$0xff]  ;;  %v277_v31 = vld [vmem:[#allocation8 + $0x8] sm:$0xff] }
  0x2d   :  { %353 = vmatpush.msra.mxu3 %v279_v27  ;;  %v284_v32 = vld [vmem:[#allocation10] sm:$0xff]  ;;  %v700_v40 = vld [vmem:[#allocation14 + $0x18] sm:$0xff]  ;;  %v1050_v42 = vld [vmem:[%s1675_s3] sm:$0xff] }
  0x2e   :  { %213 = vmatpush.msra.mxu0 %v183_v3  ;;  %1056 = vmatpush.msra.mxu2 %v183_v3  ;;  %v276_v33 = vld [vmem:[#allocation8] sm:$0xff]  ;;  %v280_v34 = vld [vmem:[%s1694_s5] sm:$0xff]  ;;  %v281_v35 = vld [vmem:[%s1694_s5 + $0x8] sm:$0xff] }
  0x2f   :  { %987 = vmatmul.msk.f32.vlgmr.msra.gmra.mxu0 %vm191_vm0, %v181_v4  ;;  %988 = vmatmul.msk.f32.vlgmr.msra.gmra.mxu2 %vm191_vm0, %v182_v5  ;;  %v282_v37 = vld [vmem:[%s1694_s5 + $0x10] sm:$0xff]  ;;  %v283_v43 = vld [vmem:[%s1694_s5 + $0x18] sm:$0x3f]  ;;  %v699_v44 = vld [vmem:[#allocation14 + $0x10] sm:$0xff] }
  0x30   :  { %312 = vmatpush.msrb.mxu2 %v287_v26  ;;  %354 = vmatpush.msra.mxu3 %v278_v29  ;;  %v698_v45 = vld [vmem:[#allocation14 + $0x8] sm:$0xff]  ;;  %v697_v46 = vld [vmem:[#allocation14] sm:$0xff]  ;;  %v917_v48 = vld [vmem:[#allocation14 + $0x58] sm:$0xff]  ;;  %v1358_v29 = vmov 0  }
  0x31   :  { %v916_v49 = vld [vmem:[#allocation14 + $0x50] sm:$0xff]  ;;  %v1051_v51 = vld [vmem:[%s1675_s3 + $0x8] sm:$0x70]  ;;  %v915_v52 = vld [vmem:[#allocation14 + $0x48] sm:$0xff]  ;;  %1073 = vset.pattern.permute.xlu0 %v1358_v29  ;;  %1074 = vset.pattern.permute.xlu1 %v1358_v29 }
  0x32   :  { %313 = vmatpush.msrb.mxu2 %v286_v28  ;;  %355 = vmatpush.msra.mxu3 %v277_v31  ;;  %v1013_v50 = vld [vmem:[%s1675_s3 + $0x8] sm:$0xf]  ;;  %v914_v55 = vld [vmem:[#allocation14 + $0x40] sm:$0xff]  ;;  %v565_v60 = vld [vmem:[#allocation11 + $0x8] sm:$0xff] }
  0x33   :  { %v1014_v54 = vor.u32 %v1051_v51, %v1013_v50  ;;  %v567_v58 = vld [vmem:[#allocation11 + $0x18] sm:$0xff]  ;;  %v566_v59 = vld [vmem:[#allocation11 + $0x10] sm:$0xff]  ;;  %v564_v61 = vld [vmem:[#allocation11] sm:$0xff]  ;;  %1075 = vset.pattern.permute.xlu2 %v1358_v29 }
  0x34   :  { %314 = vmatpush.msrb.mxu2 %v285_v30  ;;  %356 = vmatpush.msra.mxu3 %v276_v33  ;;  %v1078_v2 = vld [vmem:[%s1681_s9] ss:$0 sm:$0xff]  ;;  %v235_v51 = vld [vmem:[%s1675_s3 + $0xc] sm:$0x7]  ;;  %s970_s9 = sshll.u32 %s1689_s17, 4  ;;  %s971_s9 = int_to_ptr.hbm [resolvable:$true] %s970_s9 }
  0x36   :  { %315 = vmatpush.msrb.mxu2 %v284_v32 }
  0x37   :  { %999 = vmatmul.msk.f32.vlgmr.msrb.gmra.mxu2 %vm191_vm0, %v280_v34 }
  0x3f   :  { %1000 = vmatmul.msk.f32.gmra.mxu2 %vm191_vm0, %v281_v35 }
  0x47   :  { %1001 = vmatmul.msk.f32.gmra.mxu2 %vm191_vm0, %v282_v37 }
  0x4f   :  { %1002 = vmatmul.msk.f32.gmra.mxu2 %vm191_vm0, %v283_v43 }
  0xac   :  { %v215_v7 = vpop.f32.mrf.mxu0 }
  0xad   :  { %v216_v8 = vadd.f32 %v1076_v6, %v215_v7 }
  0xaf   :  { %vm221_vm1 = vcmp.gt.f32.partialorder %v216_v8, 0.0  ;;  %v223_v10 = vmul.f32 0.01, %v216_v8 }
  0xb1   :  { %v1500_v11 = vsel %vm221_vm1, %v216_v8, %v223_v10 }
  0xb2   :  { %v218_v12 = vpop.f32.mrf.mxu2  ;;  %v407_v13 = vmul.f32 %v1077_v9, %v1500_v11 }
  0xb3   :  { %v219_v14 = vadd.f32 %v1076_v6, %v218_v12 }
  0xb4   :  { %v409_v15 = vsel %vm191_vm0, %v407_v13, 0.0 }
  0xb5   :  { %vm222_vm2 = vcmp.gt.f32.partialorder %v219_v14, 0.0  ;;  %v224_v16 = vmul.f32 0.01, %v219_v14  ;;  %410 = vadd.xlane.f32.xlu0 %v409_v15 }
  0xb7   :  { %v1504_v17 = vsel %vm222_vm2, %v219_v14, %v224_v16 }
  0xb8   :  { %v227_v18 = vpack.c.bf16 %v1504_v17, %v1500_v11  ;;  %v408_v19 = vmul.f32 %v1077_v9, %v1504_v17 }
  0xba   :  { %v255_v20 = vsel %vm253_vm3, %v227_v18, 0  ;;  %v413_v22 = vsel %vm412_vm4, %v408_v19, 0.0  ;;  %v317_v62 = vpop.f32.mrf.mxu2 }
  0xbb   :  { %264 = vmatpush.bf16.msra.mxu1 %v255_v20 }
  0xbd   :  { %414 = vadd.xlane.f32.xlu0 %v413_v22 }
  0xbe   :  { %997 = vmatmul.msk.bf16.vlgmr.msra.gmra.mxu1 %vm246_vm5, %v1048_v21 }
  0xbf   :  { %592 = vmatpush.msrb.mxu1 %v567_v58 }
  0xc1   :  { %593 = vmatpush.msrb.mxu1 %v566_v59 }
  0xc2   :  { %v320_v1 = vpop.f32.mrf.mxu2 }
  0xc3   :  { %594 = vmatpush.msrb.mxu1 %v565_v60 }
  0xc5   :  { %595 = vmatpush.msrb.mxu1 %v564_v61 }
  0xca   :  { %v323_v10 = vpop.f32.mrf.mxu2 }
  0xce   :  { %998 = vmatmul.msk.bf16.gmra.mxu1 %vm246_vm5, %v996_v25 }
  0xd2   :  { %v326_v20 = vpop.f32.mrf.mxu2 }
 0x128   :  { %v411_v36 = vpop.xlane.xlu0 %410 }
 0x130   :  { %v415_v38 = vpop.xlane.xlu0 %414 }
 0x131   :  { %v416_v39 = vpack.c.bf16 %v415_v38, %v411_v36 }
 0x133   :  { %v434_v41 = vsel %vm253_vm3, %v416_v39, 0  ;;  %vm506_vm3 = vcmask 78848  }
 0x134   :  { %443 = vmatpush.bf16.msrb.mxu0 %v434_v41 }
 0x137   :  { %1015 = vmatmul.msk.bf16.vlgmr.msrb.gmra.mxu0 %vm246_vm5, %v1050_v42 }
 0x138   :  { %723 = vmatpush.msra.mxu0 %v700_v40 }
 0x13a   :  { %724 = vmatpush.msra.mxu0 %v699_v44 }
 0x13b   :  { %v266_v47 = vpop.f32.mrf.mxu1 }
 0x13c   :  { %725 = vmatpush.msra.mxu0 %v698_v45  ;;  %1003 = vmatmul.msk.f32.vlgmr.msra.gmra.mxu3 %vm191_vm0, %v266_v47 }
 0x13e   :  { %726 = vmatpush.msra.mxu0 %v697_v46 }
 0x140   :  { %935 = vmatpush.msrb.mxu0 %v917_v48 }
 0x142   :  { %936 = vmatpush.msrb.mxu0 %v916_v49 }
 0x143   :  { %v268_v53 = vpop.f32.mrf.mxu1 }
 0x144   :  { %1004 = vmatmul.msk.f32.gmra.mxu3 %vm191_vm0, %v268_v53  ;;  %937 = vmatpush.msrb.mxu0 %v915_v52  ;;  %v234_v52 = vld [vmem:[%s1675_s3 + $0x8] sm:$0xf]  ;;  %v232_v53 = vld [vmem:[%s1675_s3] sm:$0xff]  }
 0x145   :  { %v472_v59 = vunpack.c.h.bf16 %v232_v53 }
 0x146   :  { %938 = vmatpush.msrb.mxu0 %v914_v55  ;;  %v473_v55 = vunpack.c.l.bf16 %v234_v52 }
 0x147   :  { %1016 = vmatmul.msk.bf16.gmra.mxu0 %vm246_vm5, %v1014_v54  ;;  %v474_v54 = vunpack.c.l.bf16 %v235_v51 }
 0x148   :  { %vm1585_vm1 = vcmp.gt.f32.partialorder %v473_v55, 0.5 }
 0x149   :  { %vm1581_vm15 = vcmp.gt.f32.partialorder %v474_v54, 0.5 }
 0x14b   :  { %v271_v56 = vpop.f32.mrf.mxu1 }
 0x14c   :  { %1005 = vmatmul.msk.f32.gmra.mxu3 %vm191_vm0, %v271_v56  ;;  %v471_v56 = vunpack.c.l.bf16 %v232_v53 }
 0x14e   :  { %vm1589_vm2 = vcmp.gt.f32.partialorder %v471_v56, 0.5 }
 0x153   :  { %v273_v57 = vpop.f32.mrf.mxu1 }
 0x154   :  { %1006 = vmatmul.msk.f32.gmra.mxu3 %vm191_vm0, %v273_v57 }
 0x157   :  { %1030 = vmatmul.msk.f32.vlgmr.msra.gmra.mxu0 %vm191_vm0, %v1500_v11 }
 0x15f   :  { %1031 = vmatmul.msk.f32.gmra.mxu0 %vm191_vm0, %v1504_v17 }
 0x167   :  { %1046 = vmatmul.msk.f32.vlgmr.msrb.gmra.mxu0 %vm191_vm0, %v1500_v11 }
 0x16f   :  { %1047 = vmatmul.msk.f32.gmra.mxu0 %vm191_vm0, %v1504_v17 }
 0x1b4   :  { %v445_v30 = vpop.f32.mrf.mxu0 }
 0x1bc   :  { %v447_v34 = vpop.f32.mrf.mxu0 }
 0x1bf   :  { %v358_v63 = vpop.f32.mrf.mxu3 }
 0x1c0   :  { %v359_v0 = vadd.f32 %v358_v63, %v317_v62 }
 0x1c2   :  { %vm370_vm6 = vcmp.gt.f32.partialorder %v359_v0, 0.0  ;;  %v374_v3 = vmul.f32 0.01, %v359_v0 }
 0x1c4   :  { %v378_v4 = vsel %vm370_vm6, %v359_v0, %v374_v3  ;;  %v450_v40 = vpop.f32.mrf.mxu0  ;;  %vm1595_vm6 = vcmp.gt.f32.partialorder %v472_v59, 0.5 }
 0x1c5   :  { %1017 = vmatmul.msk.f32.vlgmr.msrb.gmra.mxu1 %vm191_vm0, %v378_v4  ;;  %v386_v5 = vmul.f32 %v1078_v2, %v378_v4 }
 0x1c7   :  { %v361_v6 = vpop.f32.mrf.mxu3  ;;  %v390_v7 = vsel %vm191_vm0, %v386_v5, 0.0 }
 0x1c8   :  { %v362_v8 = vadd.f32 %v361_v6, %v320_v1  ;;  %391 = vadd.xlane.f32.xlu1 %v390_v7 }
 0x1ca   :  { %v375_v9 = vmul.f32 0.01, %v362_v8  ;;  %vm371_vm7 = vcmp.gt.f32.partialorder %v362_v8, 0.0 }
 0x1cc   :  { %v379_v12 = vsel %vm371_vm7, %v362_v8, %v375_v9  ;;  %v452_v45 = vpop.f32.mrf.mxu0  ;;  %vm630_vm7 = vcmask 1046528  }
 0x1cd   :  { %1018 = vmatmul.msk.f32.gmra.mxu1 %vm191_vm0, %v379_v12  ;;  %v387_v13 = vmul.f32 %v1078_v2, %v379_v12 }
 0x1cf   :  { %v364_v14 = vpop.f32.mrf.mxu3  ;;  %v393_v15 = vsel %vm191_vm0, %v387_v13, 0.0 }
 0x1d0   :  { %v365_v16 = vadd.f32 %v364_v14, %v323_v10  ;;  %394 = vadd.xlane.f32.xlu1 %v393_v15 }
 0x1d2   :  { %v376_v18 = vmul.f32 0.01, %v365_v16  ;;  %vm372_vm8 = vcmp.gt.f32.partialorder %v365_v16, 0.0 }
 0x1d4   :  { %v380_v19 = vsel %vm372_vm8, %v365_v16, %v376_v18 }
 0x1d5   :  { %1019 = vmatmul.msk.f32.gmra.mxu1 %vm191_vm0, %v380_v19  ;;  %v388_v21 = vmul.f32 %v1078_v2, %v380_v19 }
 0x1d7   :  { %v367_v22 = vpop.f32.mrf.mxu3  ;;  %v396_v23 = vsel %vm191_vm0, %v388_v21, 0.0 }
 0x1d8   :  { %v368_v24 = vadd.f32 %v367_v22, %v326_v20  ;;  %397 = vadd.xlane.f32.xlu2 %v396_v23 }
 0x1da   :  { %v377_v25 = vmul.f32 0.01, %v368_v24  ;;  %vm373_vm9 = vcmp.gt.f32.partialorder %v368_v24, 0.0 }
 0x1dc   :  { %v381_v26 = vsel %vm373_vm9, %v368_v24, %v377_v25 }
 0x1dd   :  { %1020 = vmatmul.msk.f32.gmra.mxu1 %vm191_vm0, %v381_v26  ;;  %v389_v27 = vmul.f32 %v1078_v2, %v381_v26 }
 0x1df   :  { %v400_v28 = vsel %vm399_vm10, %v389_v27, 0.0 }
 0x1e0   :  { %401 = vadd.xlane.f32.xlu2 %v400_v28 }
 0x23b   :  { %v392_v31 = vpop.xlane.xlu1 %391 }
 0x23c   :  { %v455_v32 = vadd.f32 %v445_v30, %v392_v31 }
 0x23e   :  { %v463_v33 = vmul.f32 0.01, %v455_v32  ;;  %vm459_vm11 = vcmp.gt.f32.partialorder %v455_v32, 0.0 }
 0x240   :  { %v467_v35 = vsel %vm459_vm11, %v455_v32, %v463_v33 }
 0x241   :  { %481 = vperm.xlu0 %1073, %v467_v35  }
 0x242   :  { %v597_v59 = vpop.f32.mrf.mxu1 }
 0x243   :  { %v395_v36 = vpop.xlane.xlu1 %394 }
 0x244   :  { %v456_v37 = vadd.f32 %v447_v34, %v395_v36 }
 0x246   :  { %v464_v38 = vmul.f32 0.01, %v456_v37  ;;  %vm460_vm12 = vcmp.gt.f32.partialorder %v456_v37, 0.0 }
 0x248   :  { %v468_v39 = vsel %vm460_vm12, %v456_v37, %v464_v38 }
 0x249   :  { %486 = vperm.xlu1 %1074, %v468_v39  }
 0x24a   :  { %v600_v60 = vpop.f32.mrf.mxu1 }
 0x24b   :  { %v398_v41 = vpop.xlane.xlu2 %397 }
 0x24c   :  { %v457_v42 = vadd.f32 %v450_v40, %v398_v41 }
 0x24e   :  { %v465_v43 = vmul.f32 0.01, %v457_v42  ;;  %vm461_vm13 = vcmp.gt.f32.partialorder %v457_v42, 0.0 }
 0x250   :  { %v469_v44 = vsel %vm461_vm13, %v457_v42, %v465_v43 }
 0x251   :  { %491 = vperm.xlu2 %1075, %v469_v44  }
 0x252   :  { %v603_v61 = vpop.f32.mrf.mxu1 }
 0x253   :  { %v402_v46 = vpop.xlane.xlu2 %401 }
 0x254   :  { %v458_v47 = vadd.f32 %v452_v45, %v402_v46 }
 0x256   :  { %v466_v48 = vmul.f32 0.01, %v458_v47  ;;  %vm462_vm14 = vcmp.gt.f32.partialorder %v458_v47, 0.0 }
 0x258   :  { %v470_v49 = vsel %vm462_vm14, %v458_v47, %v466_v48 }
 0x259   :  { %496 = vperm.xlu2 %1075, %v470_v49  }
 0x2ab   :  { %v492_v50 = vpop.permute.xlu2 %491 }
 0x2ac   :  { %v501_v1 = vsel %vm1585_vm1, %v492_v50, -1e+30 }
 0x2ad   :  { %v505_v6 = vsel %vm246_vm5, %v501_v1, -inf }
 0x2b3   :  { %v497_v58 = vpop.permute.xlu2 %496  ;;  %v482_v62 = vpop.permute.xlu0 %481 }
 0x2b4   :  { %v502_v63 = vsel %vm1581_vm15, %v497_v58, -1e+30  ;;  %v499_v2 = vsel %vm1589_vm2, %v482_v62, -1e+30  ;;  %v606_v62 = vpop.f32.mrf.mxu1 }
 0x2b5   :  { %v507_v3 = vsel %vm506_vm3, %v502_v63, -inf  ;;  %v503_v7 = vsel %vm246_vm5, %v499_v2, -inf }
 0x2b6   :  { %v509_v9 = vmax.f32 %v505_v6, %v507_v3 }
 0x2bb   :  { %v487_v4 = vpop.permute.xlu1 %486 }
 0x2bc   :  { %v500_v5 = vsel %vm1595_vm6, %v487_v4, -1e+30 }
 0x2bd   :  { %v504_v8 = vsel %vm246_vm5, %v500_v5, -inf }
 0x2be   :  { %v508_v10 = vmax.f32 %v503_v7, %v504_v8 }
 0x2c0   :  { %v510_v12 = vmax.f32 %v508_v10, %v509_v9  ;;  %v1023_v9 = vld [vmem:[%s1676_s4] sm:$0xf]  ;;  %v1052_v10 = vld [vmem:[%s1676_s4] sm:$0x10] }
 0x2c2   :  { %v511_v13 = vrot.slane %v510_v12, 4 }
 0x2c4   :  { %v512_v14 = vmax.f32 %v510_v12, %v511_v13  ;;  %v1024_v13 = vor.u32 %v1052_v10, %v1023_v9 }
 0x2c6   :  { %v513_v15 = vrot.slane %v512_v14, 2 }
 0x2c8   :  { %v514_v16 = vmax.f32 %v512_v14, %v513_v15  ;;  %v663_v14 = vld [vmem:[#allocation13 + $0x18] sm:$0xff] }
 0x2c9   :  { %v778_v15 = vld [vmem:[#allocation13 + $0x38] sm:$0xff]  ;;  %686 = vmatpush.msrb.mxu3 %v663_v14 }
 0x2ca   :  { %v515_v18 = vrot.slane %v514_v16, 1 }
 0x2cc   :  { %v516_v19 = vmax.f32 %v514_v16, %v515_v18  ;;  %v884_v16 = vld [vmem:[#allocation13 + $0x58] sm:$0xff]  ;;  %v662_v18 = vld [vmem:[#allocation13 + $0x10] sm:$0xff] }
 0x2cd   :  { %902 = vmatpush.msra.mxu1 %v884_v16  ;;  %687 = vmatpush.msrb.mxu3 %v662_v18 }
 0x2ce   :  { %v517_v20 = vsub.f32 %v499_v2, %v516_v19  ;;  %v518_v21 = vsub.f32 %v500_v5, %v516_v19  ;;  %v519_v22 = vsub.f32 %v501_v1, %v516_v19  ;;  %v520_v23 = vsub.f32 %v502_v63, %v516_v19  ;;  %v777_v19 = vld [vmem:[#allocation13 + $0x30] sm:$0xff] }
 0x2d0   :  { %v521_v24 = vmul.f32 1.442695, %v517_v20  ;;  %v523_v25 = vmul.f32 1.442695, %v518_v21  ;;  %v525_v26 = vmul.f32 1.442695, %v519_v22 }
 0x2d1   :  { %v527_v27 = vmul.f32 1.442695, %v520_v23  ;;  %v883_v20 = vld [vmem:[#allocation13 + $0x50] sm:$0xff]  ;;  %v661_v21 = vld [vmem:[#allocation13 + $0x8] sm:$0xff]  ;;  %v660_v23 = vld [vmem:[#allocation13] sm:$0xff] }
 0x2d2   :  { %1086 = vpow2.f32 %v521_v24  ;;  %v776_v22 = vld [vmem:[#allocation13 + $0x28] sm:$0xff]  ;;  %903 = vmatpush.msra.mxu1 %v883_v20  ;;  %688 = vmatpush.msrb.mxu3 %v661_v21 }
 0x2d3   :  { %1088 = vpow2.f32 %v523_v25  ;;  %v882_v24 = vld [vmem:[#allocation13 + $0x48] sm:$0xff]  ;;  %v775_v25 = vld [vmem:[#allocation13 + $0x20] sm:$0xff] }
 0x2d4   :  { %1090 = vpow2.f32 %v525_v26  ;;  %904 = vmatpush.msra.mxu1 %v882_v24  ;;  %v881_v26 = vld [vmem:[#allocation13 + $0x40] sm:$0xff]  ;;  %689 = vmatpush.msrb.mxu3 %v660_v23 }
 0x2d5   :  { %1092 = vpow2.f32 %v527_v27  ;;  %v811_v27 = vld [vmem:[#allocation14 + $0x38] sm:$0xff] }
 0x2d6   :  { %905 = vmatpush.msra.mxu1 %v881_v26  ;;  %829 = vmatpush.msra.mxu3 %v811_v27 }
 0x2d8   :  { %v1087_v28 = vpop.eup %1086 }
 0x2d9   :  { %v1089_v29 = vpop.eup %1088  ;;  %v529_v30 = vsel %vm1589_vm2, %v1087_v28, 0.0  ;;  %v810_v28 = vld [vmem:[#allocation14 + $0x30] sm:$0xff] }
 0x2da   :  { %v1091_v31 = vpop.eup %1090  ;;  %v530_v32 = vsel %vm1595_vm6, %v1089_v29, 0.0  ;;  %v533_v33 = vsel %vm246_vm5, %v529_v30, 0.0  ;;  %v809_v29 = vld [vmem:[#allocation14 + $0x28] sm:$0xff]  ;;  %830 = vmatpush.msra.mxu3 %v810_v28 }
 0x2db   :  { %v1093_v34 = vpop.eup %1092  ;;  %v531_v35 = vsel %vm1585_vm1, %v1091_v31, 0.0  ;;  %v534_v36 = vsel %vm246_vm5, %v530_v32, 0.0  ;;  %v808_v31 = vld [vmem:[#allocation14 + $0x20] sm:$0xff] }
 0x2dc   :  { %v535_v37 = vadd.f32 %v534_v36, %v533_v33  ;;  %v532_v38 = vsel %vm1581_vm15, %v1093_v34, 0.0  ;;  %v536_v39 = vsel %vm246_vm5, %v531_v35, 0.0  ;;  %831 = vmatpush.msra.mxu3 %v809_v29 }
 0x2dd   :  { %v538_v41 = vsel %vm506_vm3, %v532_v38, 0.0 }
 0x2de   :  { %v537_v40 = vadd.f32 %v536_v39, %v535_v37  ;;  %832 = vmatpush.msra.mxu3 %v808_v31 }
 0x2e0   :  { %v539_v42 = vadd.f32 %v538_v41, %v537_v40 }
 0x2e2   :  { %v540_v43 = vrot.slane %v539_v42, 4 }
 0x2e4   :  { %v541_v44 = vadd.f32 %v540_v43, %v539_v42 }
 0x2e6   :  { %v542_v45 = vrot.slane %v541_v44, 2 }
 0x2e8   :  { %v543_v46 = vadd.f32 %v542_v45, %v541_v44 }
 0x2ea   :  { %v544_v47 = vrot.slane %v543_v46, 1 }
 0x2ec   :  { %v545_v48 = vadd.f32 %v544_v47, %v543_v46  ;;  %v728_v46 = vpop.f32.mrf.mxu0  ;;  %v1079_v47 = vld [vmem:[%s1688_s16] ss:$0 sm:$0xff] }
 0x2ee   :  { %v546_v49 = vmax.f32 %v545_v48, 1e-20  ;;  %v1082_v48 = vld [vmem:[%s1687_s15] ss:$0 sm:$0xff] }
 0x2f0   :  { %1094 = vrcp.f32 %v546_v49 }
 0x2f6   :  { %v1095_v50 = vpop.eup %1094 }
 0x2f7   :  { %v551_v51 = vmul.f32 %v1095_v50, %v532_v38  ;;  %v550_v52 = vmul.f32 %v1095_v50, %v531_v35  ;;  %v548_v53 = vmul.f32 %v1095_v50, %v529_v30  ;;  %v549_v57 = vmul.f32 %v1095_v50, %v530_v32  ;;  %v1081_v30 = vld [vmem:[%s1684_s12] ss:$0 sm:$0xff] }
 0x2f8   :  { %v729_v50 = vadd.f32 %v1079_v47, %v728_v46 }
 0x2f9   :  { %v561_v54 = vsel %vm506_vm3, %v551_v51, 0.0  ;;  %v558_v55 = vsel %vm246_vm5, %v550_v52, 0.0  ;;  %v552_v56 = vsel %vm246_vm5, %v548_v53, 0.0  ;;  %v555_v58 = vsel %vm246_vm5, %v549_v57, 0.0 }
 0x2fa   :  { %562 = vadd.xlane.f32.xlu2 %v561_v54  ;;  %559 = vadd.xlane.f32.xlu1 %v558_v55  ;;  %vm626_vm5 = vcmask 244736   ;;  %v731_v54 = vpop.f32.mrf.mxu0 }
 0x2fb   :  { %553 = vadd.xlane.f32.xlu0 %v552_v56  ;;  %v732_v56 = vadd.f32 %v1079_v47, %v731_v54 }
 0x302   :  { %556 = vadd.xlane.f32.xlu1 %v555_v58 }
 0x36d   :  { %v563_v63 = vpop.xlane.xlu2 %562  ;;  %v560_v0 = vpop.xlane.xlu1 %559 }
 0x36e   :  { %v612_v1 = vmul.f32 %v606_v62, %v563_v63  ;;  %v611_v2 = vmul.f32 %v603_v61, %v560_v0  ;;  %v554_v5 = vpop.xlane.xlu0 %553  ;;  %v1083_v61 = vld [vmem:[%s1687_s15 + $0x1] ss:$0 sm:$0xff] }
 0x36f   :  { %v609_v7 = vmul.f32 %v597_v59, %v554_v5  ;;  %v1085_v63 = vld [vmem:[%s1688_s16 + $0x1] ss:$0 sm:$0xff] }
 0x370   :  { %v616_v3 = vpack.c.bf16 %v612_v1, %v611_v2 }
 0x372   :  { %v632_v4 = vsel %vm630_vm7, %v616_v3, 0 }
 0x373   :  { %640 = vmatpush.bf16.msra.mxu2 %v632_v4 }
 0x375   :  { %v557_v6 = vpop.xlane.xlu1 %556 }
 0x376   :  { %v610_v8 = vmul.f32 %v600_v60, %v557_v6 }
 0x378   :  { %v615_v12 = vpack.c.bf16 %v610_v8, %v609_v7 }
 0x37a   :  { %641 = vmatpush.bf16.msra.mxu2 %v615_v12 }
 0x37d   :  { %1025 = vmatmul.msk.bf16.vlgmr.msra.gmra.mxu2 %vm626_vm5, %v1024_v13 }
 0x37e   :  { %796 = vmatpush.msrb.mxu2 %v778_v15 }
 0x380   :  { %797 = vmatpush.msrb.mxu2 %v777_v19 }
 0x382   :  { %798 = vmatpush.msrb.mxu2 %v776_v22  ;;  %v940_v22 = vpop.f32.mrf.mxu0 }
 0x384   :  { %799 = vmatpush.msrb.mxu2 %v775_v25 }
 0x400   :  { %v643_v32 = vpop.f32.mrf.mxu2 }
 0x401   :  { %v644_v33 = vadd.f32 %v1081_v30, %v643_v32 }
 0x403   :  { %v650_v34 = vmin.f32 %v644_v33, 0.0  ;;  %vm648_vm8 = vcmp.gt.f32.partialorder %v644_v33, 0.0 }
 0x405   :  { %v652_v35 = vmul.f32 1.442695, %v650_v34  ;;  %v1084_v34 = vld [vmem:[%s1687_s15 + $0x2] ss:$0 sm:$0xff]  ;;  %s1359_s15 = smov [#allocation16]  }
 0x407   :  { %1096 = vpow2.f32 %v652_v35 }
 0x408   :  { %v645_v36 = vpop.f32.mrf.mxu2 }
 0x409   :  { %v646_v37 = vadd.f32 %v1081_v30, %v645_v36 }
 0x40b   :  { %v651_v38 = vmin.f32 %v646_v37, 0.0  ;;  %vm649_vm9 = vcmp.gt.f32.partialorder %v646_v37, 0.0 }
 0x40d   :  { %v1097_v39 = vpop.eup %1096  ;;  %v654_v40 = vmul.f32 1.442695, %v651_v38 }
 0x40e   :  { %v1026_v41 = vadd.f32 -1.0, %v1097_v39 }
 0x40f   :  { %1098 = vpow2.f32 %v654_v40 }
 0x410   :  { %v658_v42 = vsel %vm648_vm8, %v644_v33, %v1026_v41 }
 0x411   :  { %1028 = vmatmul.msk.f32.vlgmr.msrb.gmra.mxu3 %vm191_vm0, %v658_v42  ;;  %1035 = vmatmul.msk.f32.vlgmr.msrb.gmra.mxu2 %vm191_vm0, %v658_v42 }
 0x412   :  { %1043 = vmatmul.msk.f32.vlgmr.msra.gmra.mxu1 %vm191_vm0, %v658_v42  ;;  %1057 = vmatpush.msrb.mxu3 %v884_v16 }
 0x414   :  { %1058 = vmatpush.msrb.mxu3 %v883_v20 }
 0x415   :  { %v1099_v43 = vpop.eup %1098 }
 0x416   :  { %v1027_v44 = vadd.f32 -1.0, %v1099_v43  ;;  %1059 = vmatpush.msrb.mxu3 %v882_v24 }
 0x418   :  { %v659_v45 = vsel %vm649_vm9, %v646_v37, %v1027_v44  ;;  %1060 = vmatpush.msrb.mxu3 %v881_v26  ;;  %v1080_v26 = vld [vmem:[%s1688_s16 + $0x2] ss:$0 sm:$0xff]  ;;  %s968_s16 = sshll.u32 %s1359_s15, 4  ;;  %s969_s16 = int_to_ptr.vmem [resolvable:$true] %s968_s16 }
 0x419   :  { %1029 = vmatmul.msk.f32.gmra.mxu3 %vm191_vm0, %v659_v45  ;;  %1036 = vmatmul.msk.f32.gmra.mxu2 %vm191_vm0, %v659_v45  ;;  %v941_v33 = vadd.f32 %v1080_v26, %v940_v22 }
 0x421   :  { %1038 = vmatmul.msk.f32.vlgmr.msra.gmra.mxu3 %vm191_vm0, %v1500_v11 }
 0x429   :  { %1039 = vmatmul.msk.f32.gmra.mxu3 %vm191_vm0, %v1504_v17 }
 0x431   :  { %1044 = vmatmul.msk.f32.vlgmr.msrb.gmra.mxu3 %vm191_vm0, %v659_v45  ;;  %v943_v45 = vpop.f32.mrf.mxu0 }
 0x48f   :  { %v907_v35 = vpop.f32.mrf.mxu1 }
 0x490   :  { %v908_v43 = vadd.f32 %v1084_v34, %v907_v35 }
 0x494   :  { %v691_v49 = vpop.f32.mrf.mxu3  ;;  %v801_v59 = vpop.f32.mrf.mxu2 }
 0x495   :  { %v692_v51 = vadd.f32 %v1082_v48, %v691_v49  ;;  %v802_v2 = vadd.f32 %v1083_v61, %v801_v59 }
 0x497   :  { %v734_v52 = vadd.f32 %v729_v50, %v692_v51 }
 0x499   :  { %v1032_v53 = vmul.f32 -1.442695, %v734_v52  ;;  %v944_v52 = vadd.f32 %v1080_v26, %v943_v45 }
 0x49b   :  { %1100 = vpow2.f32 %v1032_v53 }
 0x49c   :  { %v694_v55 = vpop.f32.mrf.mxu3  ;;  %v804_v9 = vpop.f32.mrf.mxu2 }
 0x49d   :  { %v695_v57 = vadd.f32 %v1082_v48, %v694_v55  ;;  %v805_v14 = vadd.f32 %v1083_v61, %v804_v9 }
 0x49f   :  { %v735_v58 = vadd.f32 %v732_v56, %v695_v57 }
 0x4a1   :  { %v1101_v60 = vpop.eup %1100  ;;  %v1033_v62 = vmul.f32 -1.442695, %v735_v58 }
 0x4a2   :  { %v742_v0 = vadd.f32 1.0, %v1101_v60 }
 0x4a3   :  { %1102 = vpow2.f32 %v1033_v62 }
 0x4a4   :  { %1104 = vrcp.f32 %v742_v0  ;;  %v834_v1 = vpop.f32.mrf.mxu3  ;;  %v755_v18 = vand.u32 2147483648, %v742_v0  ;;  %v753_v20 = vand.u32 2147483647, %v742_v0  ;;  %vm749_vm11 = vweird.f32 %v742_v0 }
 0x4a5   :  { %v835_v3 = vadd.f32 %v1085_v63, %v834_v1 }
 0x4a6   :  { %v756_v29 = vor.u32 1.1754944e-38, %v755_v18  ;;  %vm754_vm13 = vcmp.eq.f32.partialorder %v753_v20, 8.507059e+37 }
 0x4a7   :  { %v840_v4 = vadd.f32 %v835_v3, %v802_v2 }
 0x4a9   :  { %v1103_v5 = vpop.eup %1102  ;;  %v1040_v6 = vmul.f32 -1.442695, %v840_v4 }
 0x4aa   :  { %v1105_v7 = vpop.eup %1104  ;;  %v743_v8 = vadd.f32 1.0, %v1103_v5 }
 0x4ab   :  { %v745_v10 = vmul.f32 %v1105_v7, %v742_v0  ;;  %1106 = vpow2.f32 %v1040_v6  ;;  %vm750_vm10 = vweird.f32 %v1105_v7 }
 0x4ac   :  { %1108 = vrcp.f32 %v743_v8  ;;  %v837_v12 = vpop.f32.mrf.mxu3  ;;  %vm751_vm12 = vmor %vm749_vm11, %vm750_vm10  ;;  %v770_v37 = vand.u32 2147483648, %v743_v8  ;;  %v768_v39 = vand.u32 2147483647, %v743_v8  ;;  %vm764_vm15 = vweird.f32 %v743_v8 }
 0x4ad   :  { %v746_v13 = vsub.f32 1.0, %v745_v10  ;;  %v838_v15 = vadd.f32 %v1085_v63, %v837_v12 }
 0x4ae   :  { %v771_v48 = vor.u32 1.1754944e-38, %v770_v37  ;;  %vm769_vm2 = vcmp.eq.f32.partialorder %v768_v39, 8.507059e+37 }
 0x4af   :  { %v747_v16 = vmul.f32 %v1105_v7, %v746_v13  ;;  %v841_v19 = vadd.f32 %v838_v15, %v805_v14 }
 0x4b1   :  { %v1107_v21 = vpop.eup %1106  ;;  %v748_v23 = vadd.f32 %v1105_v7, %v747_v16  ;;  %v1041_v24 = vmul.f32 -1.442695, %v841_v19 }
 0x4b2   :  { %v1109_v25 = vpop.eup %1108  ;;  %v848_v27 = vadd.f32 1.0, %v1107_v21 }
 0x4b3   :  { %v752_v28 = vsel %vm751_vm12, %v1105_v7, %v748_v23  ;;  %1110 = vpow2.f32 %v1041_v24  ;;  %v760_v30 = vmul.f32 %v1109_v25, %v743_v8  ;;  %vm765_vm14 = vweird.f32 %v1109_v25 }
 0x4b4   :  { %1112 = vrcp.f32 %v848_v27  ;;  %v757_v31 = vsel %vm754_vm13, %v756_v29, %v752_v28  ;;  %vm766_vm1 = vmor %vm764_vm15, %vm765_vm14  ;;  %v861_v53 = vand.u32 2147483648, %v848_v27  ;;  %v910_v55 = vpop.f32.mrf.mxu3  ;;  %v859_v56 = vand.u32 2147483647, %v848_v27 }
 0x4b5   :  { %v761_v32 = vsub.f32 1.0, %v760_v30  ;;  %v946_v38 = vmul.f32 %v941_v33, %v757_v31  ;;  %vm855_vm6 = vweird.f32 %v848_v27  ;;  %v911_v60 = vadd.f32 %v1084_v34, %v910_v55 }
 0x4b6   :  { %v862_v61 = vor.u32 1.1754944e-38, %v861_v53  ;;  %vm860_vm5 = vcmp.eq.f32.partialorder %v859_v56, 8.507059e+37 }
 0x4b7   :  { %v762_v36 = vmul.f32 %v1109_v25, %v761_v32  ;;  %v948_v49 = vadd.f32 %v946_v38, %v908_v43 }
 0x4b9   :  { %v1111_v40 = vpop.eup %1110  ;;  %v763_v41 = vadd.f32 %v1109_v25, %v762_v36 }
 0x4ba   :  { %v1113_v42 = vpop.eup %1112  ;;  %v849_v44 = vadd.f32 1.0, %v1111_v40 }
 0x4bb   :  { %v851_v46 = vmul.f32 %v1113_v42, %v848_v27  ;;  %v767_v47 = vsel %vm766_vm1, %v1109_v25, %v763_v41  ;;  %vm856_vm3 = vweird.f32 %v1113_v42 }
 0x4bc   :  { %1114 = vrcp.f32 %v849_v44  ;;  %v772_v51 = vsel %vm769_vm2, %v771_v48, %v767_v47  ;;  %vm857_vm7 = vmor %vm855_vm6, %vm856_vm3  ;;  %v876_v5 = vand.u32 2147483648, %v849_v44  ;;  %v874_v6 = vand.u32 2147483647, %v849_v44 }
 0x4bd   :  { %v852_v50 = vsub.f32 1.0, %v851_v46  ;;  %1116 = vtanh.f32 %v948_v49  ;;  %v947_v57 = vmul.f32 %v944_v52, %v772_v51  ;;  %vm870_vm9 = vweird.f32 %v849_v44 }
 0x4be   :  { %v877_v13 = vor.u32 1.1754944e-38, %v876_v5  ;;  %vm875_vm11 = vcmp.eq.f32.partialorder %v874_v6, 8.507059e+37 }
 0x4bf   :  { %v853_v54 = vmul.f32 %v1113_v42, %v852_v50  ;;  %v949_v0 = vadd.f32 %v947_v57, %v911_v60 }
 0x4c1   :  { %v854_v58 = vadd.f32 %v1113_v42, %v853_v54  ;;  %1118 = vtanh.f32 %v949_v0 }
 0x4c2   :  { %v1115_v59 = vpop.eup %1114 }
 0x4c3   :  { %v866_v62 = vmul.f32 %v1115_v59, %v849_v44  ;;  %v858_v63 = vsel %vm857_vm7, %v1113_v42, %v854_v58  ;;  %v1117_v4 = vpop.eup %1116  ;;  %vm871_vm8 = vweird.f32 %v1115_v59 }
 0x4c4   :  { %v863_v1 = vsel %vm860_vm5, %v862_v61, %v858_v63  ;;  %vm872_vm10 = vmor %vm870_vm9, %vm871_vm8 }
 0x4c5   :  { %v867_v2 = vsub.f32 1.0, %v866_v62  ;;  %v952_v3 = vsub.f32 1.0, %v863_v1  ;;  %v956_v9 = vmul.f32 %v863_v1, %v1500_v11 }
 0x4c7   :  { %v868_v7 = vmul.f32 %v1115_v59, %v867_v2  ;;  %v954_v8 = vmul.f32 %v1117_v4, %v952_v3  ;;  %v1119_v19 = vpop.eup %1118 }
 0x4c9   :  { %v869_v10 = vadd.f32 %v1115_v59, %v868_v7  ;;  %v958_v12 = vadd.f32 %v956_v9, %v954_v8 }
 0x4cb   :  { %v873_v14 = vsel %vm872_vm10, %v1115_v59, %v869_v10  ;;  %v960_v15 = vmax.f32 %v958_v12, 0.0 }
 0x4cc   :  { %v878_v16 = vsel %vm875_vm11, %v877_v13, %v873_v14 }
 0x4cd   :  { %v953_v18 = vsub.f32 1.0, %v878_v16  ;;  %962 = vst.msk [vmem:[#allocation16] sm:$0xff] %vm191_vm0, %v960_v15  ;;  %v957_v21 = vmul.f32 %v878_v16, %v1504_v17 }
 0x4cf   :  { %v955_v20 = vmul.f32 %v1119_v19, %v953_v18 }
 0x4d1   :  { %v959_v11 = vadd.f32 %v957_v21, %v955_v20 }
 0x4d3   :  { %v961_v22 = vmax.f32 %v959_v11, 0.0 }
 0x4d5   :  { %963 = vst.msk [vmem:[#allocation16 + $0x8] sm:$0x3] %vm412_vm4, %v961_v22 }
 0x4d6   :  { %976 = dma.vmem_to_hbm [thread:$0]  %s969_s16, 256, %s971_s9, [#allocation4], %s1349_s18, %s1349_s18, %s1350_s19  }
 0x4d7   :  { %1346 = dma.done.wait [#allocation4], 256  }
 0x4d8   :  { %1347 = vsyncadd [#allocation4], 4294967040 }
 0x4d9   :  { %981 = vsyncpa [#allocation3], 1 }
 0x4da   :  { %982 = vsyncpa [#allocation6], 1 }
 0x4db   :  { %983 = vsyncpa [#allocation9], 1 }
 0x4dc   :  { %984 = vsyncpa [#allocation12], 1 }
 0x4dd   :  { %985 = vsyncpa [#allocation15], 1 }
 0x4de   :  { %986 = vsyncpa [#allocation4], 1 }

</bundles_post_ra>
